<compile_context>
chip_gen: v7x
topology: tpu7x:2x2x1
jax: 0.10.0
libtpu: 0.0.40
codegen_flags: <defaults>
</compile_context>

<pallas_src>
import functools

import jax
import jax.numpy as jnp
from jax import lax
from jax.experimental import pallas as pl
from jax.experimental.pallas import tpu as pltpu


def _round_up(x, m):
    return ((x + m - 1) // m) * m


_SEM_POOL = 16  # rotating DMA semaphores per buffer slot (power of two)


# --------------------------------------------------------------------------
# Path 1: small-vocab one-hot MXU gather (table resident in VMEM).
# --------------------------------------------------------------------------
def _onehot_kernel(idx_ref, w_ref, o_ref, *, pad_idx, precision):
    # idx_ref: (tb, 1) int32 token ids for this tile
    # w_ref:   (num_p, dim_p) zero-padded embedding table (VMEM)
    # o_ref:   (tb, dim_p) gathered embeddings
    ids = idx_ref[...]                                     # (tb, 1)
    tb = ids.shape[0]
    num_p = w_ref.shape[0]
    col = lax.broadcasted_iota(jnp.int32, (tb, num_p), 1)  # (tb, num_p)
    hit = col == ids                                       # padded cols never hit
    if pad_idx is not None:
        hit = jnp.logical_and(hit, col != pad_idx)         # zero the pad row
    onehot = hit.astype(w_ref.dtype)                       # compare + cast
    o_ref[...] = jnp.dot(
        onehot,
        w_ref[...],
        preferred_element_type=jnp.float32,
        precision=precision,                               # HIGHEST only for f32 tables
    ).astype(o_ref.dtype)


# --------------------------------------------------------------------------
# Path 2: HBM DMA row gather with cross-step double-buffered prefetch.
# --------------------------------------------------------------------------
def _gather_kernel(idx_smem, idxv_ref, w_hbm, o_ref, buf, sem, *, pad_idx, g):
    # idx_smem: (n_total,) int32 in SMEM (scalar prefetch) -> DMA addressing
    # idxv_ref: (g, 1) int32 in VMEM -> vectorized pad masking
    # w_hbm:    (num, dim) unpadded table left in HBM (memory_space=pl.ANY)
    # o_ref:    (g, dim) output tile
    # buf:      (2, g, dim) VMEM scratch (double buffer across grid steps)
    # sem:      (2 * _SEM_POOL,) rotating DMA semaphores
    step = pl.program_id(0)
    nsteps = pl.num_programs(0)
    cur = step % 2
    nxt = 1 - cur

    def issue_rows(tgt_step, slot):
        base = tgt_step * g

        def body(t, carry):
            row = idx_smem[base + t]
            pltpu.make_async_copy(
                w_hbm.at[pl.ds(row, 1), :],
                buf.at[slot, pl.ds(t, 1), :],
                sem.at[slot * _SEM_POOL + (t % _SEM_POOL)],
            ).start()
            return carry

        lax.fori_loop(0, g, body, 0)

    # Prime the pipeline: the first grid step fetches its own rows.
    @pl.when(step == 0)
    def _():
        issue_rows(0, cur)

    # Prefetch the next step's rows while this step's rows land.
    @pl.when(step + 1 < nsteps)
    def _():
        issue_rows(step + 1, nxt)

    # Wait for this step's rows (issued at the previous step / during priming).
    # Wait descriptors are byte-identical to the start descriptors.
    def wait_body(t, carry):
        pltpu.make_async_copy(
            w_hbm.at[pl.ds(0, 1), :],                      # dummy src, same shape
            buf.at[cur, pl.ds(t, 1), :],
            sem.at[cur * _SEM_POOL + (t % _SEM_POOL)],
        ).wait()
        return carry

    lax.fori_loop(0, g, wait_body, 0)

    rows = buf[cur]                                        # (g, dim)
    if pad_idx is not None:
        keep = (idxv_ref[...] != pad_idx).astype(rows.dtype)   # (g, 1)
        rows = rows * keep                                 # folded into the copy
    o_ref[...] = rows.astype(o_ref.dtype)


# --------------------------------------------------------------------------
# Wrapper
# --------------------------------------------------------------------------
def embedding_lookup(x, weight, pad_idx=None, *, method="auto",
                     token_block=256, rows_per_step=None):
    """x: int array of any shape; weight: (num, dim). Returns x.shape + (dim,)."""
    num, dim = weight.shape
    if pad_idx is not None:
        pad_idx = int(pad_idx) % num          # torch allows negative padding_idx

    orig_shape = x.shape
    flat = x.reshape(-1).astype(jnp.int32)
    n = flat.shape[0]
    if n == 0:                                # empty index array
        return jnp.zeros((*orig_shape, dim), weight.dtype)
    # Keep indices in-bounds (torch would raise on OOB; we must not OOB-DMA).
    flat = jnp.clip(flat, 0, num - 1)

    itemsize = jnp.dtype(weight.dtype).itemsize
    align = 8 if itemsize >= 4 else 16        # sub-32-bit dtypes pack 16 rows/vreg

    if method == "auto":
        num_pa = _round_up(num, 256)
        dim_pa = _round_up(dim, 128)
        table_bytes = num_pa * dim_pa * itemsize
        # Small tables: VMEM-resident one-hot MXU gather beats per-row DMAs
        # (descriptor-bound for small dims). Otherwise HBM DMA gather.
        method = "matmul" if (num <= 4096 and table_bytes <= 8 * 2**20) else "gather"

    if method == "matmul":
        num_p = _round_up(num, 256)           # full-width MXU K dimension
        dim_p = _round_up(dim, 128)           # lane-dense output stores
        w = weight
        if (num_p, dim_p) != (num, dim):
            w = jnp.pad(weight, ((0, num_p - num), (0, dim_p - dim)))
        tb = _round_up(min(token_block, _round_up(n, align)), align)
        n_total = _round_up(n, tb)
        idx2d = jnp.pad(flat, (0, n_total - n)).reshape(n_total, 1)
        precision = (lax.Precision.HIGHEST
                     if jnp.dtype(weight.dtype) == jnp.dtype(jnp.float32)
                     else lax.Precision.DEFAULT)
        kernel = functools.partial(_onehot_kernel, pad_idx=pad_idx,
                                   precision=precision)
        out = pl.pallas_call(
            kernel,
            out_shape=jax.ShapeDtypeStruct((n_total, dim_p), w.dtype),
            grid_spec=pltpu.PrefetchScalarGridSpec(
                num_scalar_prefetch=0,
                grid=(n_total // tb,),
                in_specs=[
                    pl.BlockSpec((tb, 1), lambda i: (i, 0)),       # token ids
                    pl.BlockSpec((num_p, dim_p), lambda i: (0, 0)),  # full table
                ],
                out_specs=pl.BlockSpec((tb, dim_p), lambda i: (i, 0)),
            ),
            compiler_params=pltpu.CompilerParams(
                dimension_semantics=("parallel",),
                vmem_limit_bytes=40 * 1024 * 1024,   # leaves headroom on v7x (64 MiB)
            ),
        )(idx2d, w)
        out = out[:n, :dim]
    else:
        # Rows are DMA'd straight from the UNPADDED table in HBM (no table copy).
        row_bytes = _round_up(dim, 128) * itemsize
        budget = 16 * 2**20                   # buf (2x g rows) + pipelined out (~2x)
        g_cap = max(align, (budget // (4 * row_bytes)) // align * align)
        g = rows_per_step if rows_per_step is not None else 512
        g = min(g, g_cap)
        g = min(g, max(align, _round_up(pl.cdiv(n, 2), align)))  # keep >= 2 grid steps
        g = max(align, _round_up(g, align))
        n_total = _round_up(n, g)
        flat_p = jnp.pad(flat, (0, n_total - n))
        idx2d = flat_p.reshape(n_total, 1)
        kernel = functools.partial(_gather_kernel, pad_idx=pad_idx, g=g)
        out = pl.pallas_call(
            kernel,
            out_shape=jax.ShapeDtypeStruct((n_total, dim), weight.dtype),
            grid_spec=pltpu.PrefetchScalarGridSpec(
                num_scalar_prefetch=1,                           # flat ids -> SMEM
                grid=(n_total // g,),
                in_specs=[
                    pl.BlockSpec((g, 1), lambda i, ids: (i, 0)),  # ids for masking
                    pl.BlockSpec(memory_space=pl.ANY),            # table stays in HBM
                ],
                out_specs=pl.BlockSpec((g, dim), lambda i, ids: (i, 0)),
                scratch_shapes=[
                    pltpu.VMEM((2, g, dim), weight.dtype),        # row double-buffer
                    pltpu.SemaphoreType.DMA((2 * _SEM_POOL,)),    # rotating sem pool
                ],
            ),
            compiler_params=pltpu.CompilerParams(
                # Cross-step DMA prefetch carries state in scratch -> must run
                # sequentially on one core.
                dimension_semantics=("arbitrary",),
                vmem_limit_bytes=32 * 1024 * 1024,
            ),
        )(flat_p, idx2d, weight)
        out = out[:n]

    return out.reshape(*orig_shape, dim)


if __name__ == "__main__":
    # Module config (small, synthetic): num=32 vocab entries, dim=128, pad_idx=0
    NUM, DIM, PAD_IDX = 32, 128, 0
    B, S = 2, 8

    key = jax.random.PRNGKey(0)
    k_w, k_x = jax.random.split(key)

    weight = jax.random.normal(k_w, (NUM, DIM), dtype=jnp.float32)
    x = jax.random.randint(k_x, (B, S), 0, NUM, dtype=jnp.int32)

    # Reference: zero the pad row, then plain gather (torch: weight[x]).
    ref = weight.at[PAD_IDX].set(0.0)[x]

    # Path 1: one-hot MXU gather (what small vocabs auto-select).
    out_mm = jax.block_until_ready(embedding_lookup(x, weight, PAD_IDX, method="matmul"))
    assert out_mm.shape == (B, S, DIM), out_mm.shape
    assert jnp.allclose(out_mm, ref, atol=1e-6, rtol=1e-6), "matmul path mismatch"

    # Path 2: HBM DMA row gather with cross-step prefetch.
    out_g = jax.block_until_ready(embedding_lookup(x, weight, PAD_IDX, method="gather"))
    assert out_g.shape == (B, S, DIM), out_g.shape
    assert jnp.allclose(out_g, ref, atol=1e-6, rtol=1e-6), "gather path mismatch"

    # Auto path selection sanity.
    out_auto = jax.block_until_ready(embedding_lookup(x, weight, PAD_IDX))
    assert jnp.allclose(out_auto, ref, atol=1e-6, rtol=1e-6), "auto path mismatch"

    # Non-aligned dim, negative pad_idx, ragged token count through the gather path.
    NUM2, DIM2, PAD2 = 300, 192, -1
    w2 = jax.random.normal(jax.random.PRNGKey(1), (NUM2, DIM2), dtype=jnp.float32)
    x2 = jax.random.randint(jax.random.PRNGKey(2), (3, 5), 0, NUM2, dtype=jnp.int32)
    ref2 = w2.at[PAD2 % NUM2].set(0.0)[x2]
    out2 = jax.block_until_ready(embedding_lookup(x2, w2, PAD2, method="gather"))
    assert out2.shape == (3, 5, DIM2), out2.shape
    assert jnp.allclose(out2, ref2, atol=1e-6, rtol=1e-6), "ragged gather mismatch"

    print("KERNEL_OK")
</pallas_src>

<mosaic_0001>
module attributes {stable_mosaic.version = 11 : i64} {
  func.func @_onehot_kernel(%arg0: i32, %arg1: memref<16x1xi32, #tpu.memory_space<vmem>>, %arg2: memref<256x128xf32, #tpu.memory_space<vmem>>, %arg3: memref<16x128xf32, #tpu.memory_space<vmem>>) attributes {dimension_semantics = [#tpu.dimension_semantics<parallel>], iteration_bounds = array<i64: 1>, scalar_prefetch = 0 : i64, scratch_operands = 0 : i64, tpu.core_type = #tpu.core_type<tc>, window_params = [{transform_indices = @transform_0, window_bounds = array<i64: 16, 1>}, {pipeline_mode = #tpu.pipeline_mode<synchronous>, transform_indices = @transform_1, window_bounds = array<i64: 256, 128>}, {transform_indices = @transform_2, window_bounds = array<i64: 16, 128>}]} {
    %c0 = arith.constant 0 : index
    %c0_0 = arith.constant 0 : index
    %0 = vector.load %arg1[%c0, %c0_0] : memref<16x1xi32, #tpu.memory_space<vmem>>, vector<16x1xi32>
    %1 = tpu.iota {dimensions = array<i32: 1>} : vector<16x256xi32>
    %2 = vector.broadcast %0 : vector<16x1xi32> to vector<16x256xi32>
    %3 = arith.cmpi eq, %1, %2 : vector<16x256xi32>
    %c0_i32 = arith.constant 0 : i32
    %4 = vector.broadcast %c0_i32 : i32 to vector<16x256xi32>
    %5 = arith.cmpi ne, %1, %4 : vector<16x256xi32>
    %6 = arith.andi %3, %5 : vector<16x256xi1>
    %7 = arith.extui %6 : vector<16x256xi1> to vector<16x256xi32>
    %8 = arith.sitofp %7 : vector<16x256xi32> to vector<16x256xf32>
    %c0_1 = arith.constant 0 : index
    %c0_2 = arith.constant 0 : index
    %9 = vector.load %arg2[%c0_1, %c0_2] : memref<256x128xf32, #tpu.memory_space<vmem>>, vector<256x128xf32>
    %cst = arith.constant dense<0.000000e+00> : vector<16x128xf32>
    %10 = tpu.matmul %8, %9, %cst {dimension_numbers = #tpu.dot_dimension_numbers<[1], [0], [0], [1], [0, 0, 1, 1], [], []>, precision = #tpu.contract_precision<fp32>} : vector<16x256xf32>, vector<256x128xf32>, vector<16x128xf32> -> vector<16x128xf32>
    %c0_3 = arith.constant 0 : index
    %c0_4 = arith.constant 0 : index
    %11 = vector.load %arg3[%c0_3, %c0_4] : memref<16x128xf32, #tpu.memory_space<vmem>>, vector<16x128xf32>
    tpu.vector_store %arg3[%c0_3, %c0_4], %10 {strides = array<i32>} : memref<16x128xf32, #tpu.memory_space<vmem>>, vector<16x128xf32>,
    return
  }
  func.func @transform_0(%arg0: i32) -> (i32, i32) {
    %c0_i32 = arith.constant 0 : i32
    %c0_i32_0 = arith.constant 0 : i32
    return %arg0, %c0_i32 : i32, i32
  }
  func.func @transform_1(%arg0: i32) -> (i32, i32) {
    %c0_i32 = arith.constant 0 : i32
    %c0_i32_0 = arith.constant 0 : i32
    %c0_i32_1 = arith.constant 0 : i32
    return %c0_i32, %c0_i32_0 : i32, i32
  }
  func.func @transform_2(%arg0: i32) -> (i32, i32) {
    %c0_i32 = arith.constant 0 : i32
    %c0_i32_0 = arith.constant 0 : i32
    return %arg0, %c0_i32 : i32, i32
  }
}

</mosaic_0001>

<bundles_post_ra>
// kernel: tpu_custom_call.1
= control target key start
LH: loop header
LB: loop body
LE: loop exit
PB: predicated region body
PF: predicated region fallthrough
CT: control target
= control target key end

     0   :  { %7 = vsyncpa [#allocation3], 0  ;;  %s2294_s0 = inlined_call_operand.vmem [shape: s32[16,1], index: 0, kind: input, shape index: {}]   ;;  %s2295_s1 = inlined_call_operand.hbm [shape: f32[256,128], index: 1, kind: input, shape index: {}]   ;;  %s2296_s2 = inlined_call_operand.hbm [shape: f32[16,128], index: 2, kind: output, shape index: {}]  }
   0x1   :  { %8 = vsyncpa [#allocation4], 0  ;;  %s1516_s9 = smov [#allocation2]   ;;  %s1468_s13 = scalar_lea.hbm %s2295_s1, 4096 }
   0x2   :  { %s16_s10 = sshll.u32 %s1516_s9, 4  ;;  %p1469_p0 = scmp.ne.s32.totalorder %s2295_s1, %s1468_s13  ;;  %s17_s10 = int_to_ptr.vmem [resolvable:$true] %s16_s10 }
   0x3   :  { %p1472_p1 = scmp.lt.u32.totalorder %s1468_s13, %s2295_s1 }
   0x5   :  { %p1474_p2 = pnand %p1472_p1, %p1469_p0 }
   0x7   :  { %1477 = shalt.err (!%p1474_p2)
}
   0x8   :  { %s1478_s18 = scalar_lea.vmem %s17_s10, 4096  ;;  %p1483_p4 = scmp.lt.s32.totalorder %s17_s10, %s17_s10 }
   0x9   :  { %p1479_p3 = scmp.ne.s32.totalorder %s17_s10, %s1478_s18  ;;  %p1484_p5 = scmp.lt.s32.totalorder %s1478_s18, %s1478_s18 }
   0xb   :  { %p1485_p6 = por %p1484_p5, %p1483_p4 }
   0xd   :  { %p1486_p7 = pnand %p1485_p6, %p1479_p3 }
   0xf   :  { %1489 = shalt.err (!%p1486_p7)
}
  0x10   :  { %s1517_s19 = smov 128   ;;  %s1518_s20 = smov 8  }
  0x11   :  { %22 = dma.hbm_to_vmem [thread:$0]  %s2295_s1, 4096, %s17_s10, [#allocation3], %s1517_s19, %s1517_s19, %s1518_s20  }
  0x12   :  { %1512 = dma.done.wait [#allocation3], 4096  }
  0x13   :  { %1513 = vsyncadd [#allocation3], 4294963200  ;;  %v1519_v0 = vmov 0   ;;  %v26_v1 = vld [vmem:[%s2294_s0] sm:$0xff]  ;;  %v27_v2 = vld [vmem:[%s2294_s0 + $0x8] sm:$0xff]  ;;  %s1522_s0 = smov [#allocation5]  }
  0x14   :  { %1467 = vset.pattern.permute.xlu0 %v1519_v0  ;;  %v1559_v3 = vld [vmem:[#allocation2 + $0x80] sm:$0xff]  ;;  %v72_v4 = vld [vmem:[#allocation2 + $0x88] sm:$0xff]  ;;  %v1568_v11 = vld [vmem:[#allocation2 + $0x90] sm:$0xff]  ;;  %s1012_s1 = sshll.u32 %s1522_s0, 4  ;;  %s1013_s1 = int_to_ptr.vmem [resolvable:$true] %s1012_s1 }
  0x15   :  { %32 = vperm.xlu0 %1467, %v26_v1   ;;  %v136_v5 = vand.u32 4294901760, %v1559_v3  ;;  %v1562_v6 = vld [vmem:[#allocation2] sm:$0xff]  ;;  %v1564_v7 = vld [vmem:[#allocation2 + $0x8] sm:$0xff]  ;;  %v139_v8 = vand.u32 4294901760, %v72_v4  ;;  %v1570_v12 = vld [vmem:[#allocation2 + $0x98] sm:$0xff]  ;;  %v142_v15 = vand.u32 4294901760, %v1568_v11  ;;  %p1495_p9 = scmp.lt.s32.totalorder %s1013_s1, %s1013_s1 }
  0x16   :  { %v88_v9 = vand.u32 4294901760, %v1562_v6  ;;  %v91_v10 = vand.u32 4294901760, %v1564_v7  ;;  %v1572_v13 = vld [vmem:[#allocation2 + $0x10] sm:$0xff]  ;;  %v145_v16 = vand.u32 4294901760, %v1570_v12  ;;  %v1579_v17 = vld [vmem:[#allocation2 + $0x18] sm:$0xff]  ;;  %v1631_v39 = vld [vmem:[#allocation2 + $0xa0] sm:$0xff] }
  0x17   :  { %v1575_v14 = vsub.f32 %v1559_v3, %v136_v5  ;;  %v94_v18 = vand.u32 4294901760, %v1572_v13  ;;  %v1582_v19 = vsub.f32 %v72_v4, %v139_v8  ;;  %v97_v22 = vand.u32 4294901760, %v1579_v17  ;;  %v1642_v44 = vld [vmem:[#allocation2 + $0xa8] sm:$0xff]  ;;  %v1647_v49 = vld [vmem:[#allocation2 + $0x20] sm:$0xff]  ;;  %v1653_v59 = vld [vmem:[#allocation2 + $0xb0] sm:$0xff]  ;;  %s1490_s27 = scalar_lea.vmem %s1013_s1, 256 }
  0x18   :  { %v1585_v20 = vsub.f32 %v1562_v6, %v88_v9  ;;  %v1588_v21 = vsub.f32 %v1564_v7, %v91_v10  ;;  %v1595_v24 = vsub.f32 %v1568_v11, %v142_v15  ;;  %v1600_v25 = vsub.f32 %v1570_v12, %v145_v16  ;;  %v1650_v54 = vld [vmem:[#allocation2 + $0x28] sm:$0xff]  ;;  %v1655_v60 = vld [vmem:[#allocation2 + $0xb8] sm:$0xff]  ;;  %v1665_v1 = vld [vmem:[#allocation2 + $0x30] sm:$0xff]  ;;  %p1491_p8 = scmp.ne.s32.totalorder %s1013_s1, %s1490_s27  ;;  %p1496_p10 = scmp.lt.s32.totalorder %s1490_s27, %s1490_s27 }
  0x19   :  { %35 = vperm.xlu0 %1467, %v27_v2   ;;  %v2317_v23 = vand.u32 4294901760, %v1575_v14  ;;  %v1605_v26 = vsub.f32 %v1572_v13, %v94_v18  ;;  %v2316_v27 = vand.u32 4294901760, %v1582_v19  ;;  %v1613_v30 = vsub.f32 %v1579_v17, %v97_v22 }
  0x1a   :  { %v2313_v28 = vand.u32 4294901760, %v1585_v20  ;;  %v2311_v29 = vand.u32 4294901760, %v1588_v21  ;;  %v2310_v32 = vand.u32 4294901760, %v1595_v24  ;;  %v2309_v33 = vand.u32 4294901760, %v1600_v25  ;;  %p1497_p11 = por %p1496_p10, %p1495_p9 }
  0x1b   :  { %v330_v31 = vsub.f32 %v1575_v14, %v2317_v23  ;;  %v2308_v34 = vand.u32 4294901760, %v1605_v26  ;;  %v337_v35 = vsub.f32 %v1582_v19, %v2316_v27  ;;  %v2302_v38 = vand.u32 4294901760, %v1613_v30  ;;  %v1878_v23 = vld [vmem:[#allocation2 + $0x60] sm:$0xff] }
  0x1c   :  { %v218_v36 = vsub.f32 %v1585_v20, %v2313_v28  ;;  %v225_v37 = vsub.f32 %v1588_v21, %v2311_v29  ;;  %v344_v41 = vsub.f32 %v1595_v24, %v2310_v32  ;;  %v351_v42 = vsub.f32 %v1600_v25, %v2309_v33  ;;  %p1498_p12 = pnand %p1497_p11, %p1491_p8 }
  0x1d   :  { %v331_v40 = vand.u32 4294901760, %v330_v31  ;;  %v232_v43 = vsub.f32 %v1605_v26, %v2308_v34  ;;  %v338_v45 = vand.u32 4294901760, %v337_v35  ;;  %v239_v48 = vsub.f32 %v1613_v30, %v2302_v38  ;;  %v1684_v35 = vld [vmem:[#allocation2 + $0x38] sm:$0xff] }
  0x1e   :  { %v219_v46 = vand.u32 4294901760, %v218_v36  ;;  %v226_v47 = vand.u32 4294901760, %v225_v37  ;;  %v345_v50 = vand.u32 4294901760, %v344_v41  ;;  %v352_v51 = vand.u32 4294901760, %v351_v42 }
  0x1f   :  { %v233_v52 = vand.u32 4294901760, %v232_v43  ;;  %v148_v53 = vand.u32 4294901760, %v1631_v39  ;;  %v1300_v55 = vpack.c.bf16 %v338_v45, %v331_v40  ;;  %v240_v57 = vand.u32 4294901760, %v239_v48 }
  0x20   :  { %v1302_v56 = vpack.c.bf16 %v226_v47, %v219_v46  ;;  %v151_v58 = vand.u32 4294901760, %v1642_v44  ;;  %v1304_v61 = vpack.c.bf16 %v352_v51, %v345_v50  ;;  %v1662_v63 = vpack.c.bf16 %v139_v8, %v136_v5 }
  0x21   :  { %v1660_v62 = vsub.f32 %v1631_v39, %v148_v53  ;;  %v100_v0 = vand.u32 4294901760, %v1647_v49  ;;  %1301 = vmatprep.subr.bf16.mxu1 %v1300_v55  ;;  %v1306_v2 = vpack.c.bf16 %v240_v57, %v233_v52  ;;  %v103_v4 = vand.u32 4294901760, %v1650_v54  ;;  %v1741_v57 = vld [vmem:[#allocation2 + $0xc8] sm:$0xff] }
  0x22   :  { %v1670_v3 = vsub.f32 %v1642_v44, %v151_v58  ;;  %v1673_v6 = vpack.c.bf16 %v91_v10, %v88_v9  ;;  %1303 = vmatpush3.bf16.msra.mxu1 %v1302_v56  ;;  %1269 = vmatprep.subr.bf16.mxu0 %v1662_v63  ;;  %v154_v8 = vand.u32 4294901760, %v1653_v59  ;;  %v157_v31 = vand.u32 4294901760, %v1655_v60  ;;  %v1739_v56 = vld [vmem:[#allocation2 + $0xc0] sm:$0xff] }
  0x23   :  { %v2300_v7 = vand.u32 4294901760, %v1660_v62  ;;  %v1680_v5 = vsub.f32 %v1647_v49, %v100_v0  ;;  %1305 = vmatprep.subr.bf16.mxu1 %v1304_v61  ;;  %v1690_v10 = vsub.f32 %v1650_v54, %v103_v4  ;;  %v1697_v36 = vpack.c.bf16 %v145_v16, %v142_v15  ;;  %v1809_v49 = vld [vmem:[#allocation2 + $0x58] sm:$0xff] }
  0x24   :  { %v2299_v9 = vand.u32 4294901760, %v1670_v3  ;;  %1271 = vmatpush3.bf16.msra.mxu0 %v1673_v6  ;;  %v106_v37 = vand.u32 4294901760, %v1665_v1  ;;  %v1707_v42 = vsub.f32 %v1653_v59, %v154_v8  ;;  %v1712_v11 = vsub.f32 %v1655_v60, %v157_v31 }
  0x25   :  { %v358_v40 = vsub.f32 %v1660_v62, %v2300_v7  ;;  %v2298_v41 = vand.u32 4294901760, %v1680_v5  ;;  %v2297_v15 = vand.u32 4294901760, %v1690_v10  ;;  %1273 = vmatprep.subr.bf16.mxu0 %v1697_v36  ;;  %v109_v16 = vand.u32 4294901760, %v1684_v35  ;;  %v1759_v7 = vld [vmem:[#allocation2 + $0x40] sm:$0xff] }
  0x26   :  { %v365_v12 = vsub.f32 %v1670_v3, %v2299_v9  ;;  %v1723_v43 = vsub.f32 %v1665_v1, %v106_v37  ;;  %1307 = vmatpush3.bf16.msra.mxu1 %v1306_v2  ;;  %v2301_v47 = vand.u32 4294901760, %v1707_v42  ;;  %v2304_v48 = vand.u32 4294901760, %v1712_v11 }
  0x27   :  { %v359_v45 = vand.u32 4294901760, %v358_v40  ;;  %v246_v46 = vsub.f32 %v1680_v5, %v2298_v41  ;;  %v253_v51 = vsub.f32 %v1690_v10, %v2297_v15  ;;  %v1737_v55 = vsub.f32 %v1684_v35, %v109_v16 }
  0x28   :  { %v366_v50 = vand.u32 4294901760, %v365_v12  ;;  %v2303_v52 = vand.u32 4294901760, %v1723_v43  ;;  %v372_v2 = vsub.f32 %v1707_v42, %v2301_v47  ;;  %v379_v40 = vsub.f32 %v1712_v11, %v2304_v48 }
  0x29   :  { %v247_v61 = vand.u32 4294901760, %v246_v46  ;;  %v1753_v12 = vpack.c.bf16 %v97_v22, %v94_v18  ;;  %v254_v41 = vand.u32 4294901760, %v253_v51  ;;  %v2305_v9 = vand.u32 4294901760, %v1737_v55  ;;  %v1764_v18 = vld [vmem:[#allocation2 + $0x48] sm:$0xff]  ;;  %v1766_v22 = vld [vmem:[#allocation2 + $0xd0] sm:$0xff] }
  0x2a   :  { %v1308_v15 = vpack.c.bf16 %v366_v50, %v359_v45  ;;  %v260_v46 = vsub.f32 %v1723_v43, %v2303_v52  ;;  %v373_v47 = vand.u32 4294901760, %v372_v2  ;;  %v380_v38 = vand.u32 4294901760, %v379_v40  ;;  %v1777_v40 = vld [vmem:[#allocation2 + $0xd8] sm:$0xff] }
  0x2b   :  { %1275 = vmatpush3.bf16.msra.mxu0 %v1753_v12  ;;  %v160_v13 = vand.u32 4294901760, %v1739_v56  ;;  %v163_v17 = vand.u32 4294901760, %v1741_v57  ;;  %v1310_v45 = vpack.c.bf16 %v254_v41, %v247_v61  ;;  %v267_v51 = vsub.f32 %v1737_v55, %v2305_v9 }
  0x2c   :  { %1309 = vmatprep.subr.bf16.mxu1 %v1308_v15  ;;  %v261_v50 = vand.u32 4294901760, %v260_v46  ;;  %v1775_v2 = vpack.c.bf16 %v151_v58, %v148_v53  ;;  %v1312_v52 = vpack.c.bf16 %v380_v38, %v373_v47  ;;  %v112_v15 = vand.u32 4294901760, %v1759_v7 }
  0x2d   :  { %v1782_v48 = vsub.f32 %v1739_v56, %v160_v13  ;;  %v1787_v41 = vsub.f32 %v1741_v57, %v163_v17  ;;  %1311 = vmatpush3.bf16.msra.mxu1 %v1310_v45  ;;  %v268_v39 = vand.u32 4294901760, %v267_v51  ;;  %v115_v44 = vand.u32 4294901760, %v1764_v18  ;;  %v1807_v45 = vld [vmem:[#allocation2 + $0x50] sm:$0xff] }
  0x2e   :  { %1277 = vmatprep.subr.bf16.mxu0 %v1775_v2  ;;  %v1796_v38 = vpack.c.bf16 %v103_v4, %v100_v0  ;;  %v2321_v53 = vand.u32 4294901760, %v1766_v22  ;;  %1313 = vmatprep.subr.bf16.mxu1 %v1312_v52  ;;  %v1804_v61 = vsub.f32 %v1759_v7, %v112_v15  ;;  %v2320_v46 = vand.u32 4294901760, %v1777_v40 }
  0x2f   :  { %v2306_v58 = vand.u32 4294901760, %v1782_v48  ;;  %v2307_v47 = vand.u32 4294901760, %v1787_v41  ;;  %v1314_v54 = vpack.c.bf16 %v268_v39, %v261_v50  ;;  %v1814_v0 = vsub.f32 %v1764_v18, %v115_v44 }
  0x30   :  { %1279 = vmatpush3.bf16.msra.mxu0 %v1796_v38  ;;  %v1820_v4 = vsub.f32 %v1766_v22, %v2321_v53  ;;  %v1826_v52 = vpack.c.bf16 %v157_v31, %v154_v8  ;;  %v2312_v39 = vand.u32 4294901760, %v1804_v61  ;;  %v1838_v9 = vsub.f32 %v1777_v40, %v2320_v46 }
  0x31   :  { %v386_v50 = vsub.f32 %v1782_v48, %v2306_v58  ;;  %v393_v51 = vsub.f32 %v1787_v41, %v2307_v47  ;;  %1315 = vmatpush3.bf16.msra.mxu1 %v1314_v54  ;;  %v2314_v59 = vand.u32 4294901760, %v1814_v0  ;;  %v2319_v8 = vand.u32 4294901760, %v1807_v45 }
  0x32   :  { %v2315_v60 = vand.u32 4294901760, %v1820_v4  ;;  %1281 = vmatprep.subr.bf16.mxu0 %v1826_v52  ;;  %v2318_v31 = vand.u32 4294901760, %v1809_v49  ;;  %v274_v34 = vsub.f32 %v1804_v61, %v2312_v39  ;;  %v2322_v33 = vand.u32 4294901760, %v1838_v9  ;;  %v1867_v39 = vld [vmem:[#allocation2 + $0xe8] sm:$0xff] }
  0x33   :  { %v387_v58 = vand.u32 4294901760, %v386_v50  ;;  %v394_v47 = vand.u32 4294901760, %v393_v51  ;;  %v281_v54 = vsub.f32 %v1814_v0, %v2314_v59  ;;  %v1858_v29 = vsub.f32 %v1807_v45, %v2319_v8  ;;  %v1865_v51 = vld [vmem:[#allocation2 + $0xe0] sm:$0xff] }
  0x34   :  { %v400_v32 = vsub.f32 %v1820_v4, %v2315_v60  ;;  %v1863_v50 = vsub.f32 %v1809_v49, %v2318_v31  ;;  %v275_v59 = vand.u32 4294901760, %v274_v34  ;;  %v407_v60 = vsub.f32 %v1838_v9, %v2322_v33 }
  0x35   :  { %v1316_v28 = vpack.c.bf16 %v394_v47, %v387_v58  ;;  %v1876_v27 = vpack.c.bf16 %v109_v16, %v106_v37  ;;  %v282_v31 = vand.u32 4294901760, %v281_v54  ;;  %v2325_v46 = vand.u32 4294901760, %v1858_v29  ;;  %v1882_v58 = vld [vmem:[#allocation2 + $0x68] sm:$0xff] }
  0x36   :  { %v401_v8 = vand.u32 4294901760, %v400_v32  ;;  %v2323_v53 = vand.u32 4294901760, %v1863_v50  ;;  %v408_v34 = vand.u32 4294901760, %v407_v60  ;;  %v172_v1 = vand.u32 4294901760, %v1865_v51  ;;  %v85_v60 = vld [vmem:[#allocation2 + $0xf0] sm:$0xff] }
  0x37   :  { %2345 = vst [vmem:[#allocation8_spill] sm:$0xff] %v1876_v27  ;;  %1317 = vmatprep.subr.bf16.mxu1 %v1316_v28  ;;  %1283 = vmatpush3.bf16.msra.mxu0 %v1876_v27  ;;  %v175_v35 = vand.u32 4294901760, %v1867_v39  ;;  %v1891_v37 = vpack.c.bf16 %v163_v17, %v160_v13  ;;  %v1318_v32 = vpack.c.bf16 %v282_v31, %v275_v59  ;;  %v124_v47 = vand.u32 4294901760, %v1878_v23  ;;  %v86_v13 = vld [vmem:[#allocation2 + $0xf8] sm:$0xff] }
  0x38   :  { %v288_v16 = vsub.f32 %v1858_v29, %v2325_v46  ;;  %v295_v28 = vsub.f32 %v1863_v50, %v2323_v53  ;;  %v1320_v54 = vpack.c.bf16 %v408_v34, %v401_v8  ;;  %v1901_v33 = vsub.f32 %v1865_v51, %v172_v1 }
  0x39   :  { %2346 = vst [vmem:[#allocation9_spill] sm:$0xff] %v1891_v37  ;;  %v1904_v56 = vsub.f32 %v1867_v39, %v175_v35  ;;  %1285 = vmatprep.subr.bf16.mxu0 %v1891_v37  ;;  %v127_v57 = vand.u32 4294901760, %v1882_v58  ;;  %1319 = vmatpush3.bf16.msra.mxu1 %v1318_v32  ;;  %v1909_v31 = vsub.f32 %v1878_v23, %v124_v47  ;;  %v178_v32 = vand.u32 4294901760, %v85_v60 }
  0x3a   :  { %v289_v17 = vand.u32 4294901760, %v288_v16  ;;  %v296_v59 = vand.u32 4294901760, %v295_v28  ;;  %v1915_v8 = vpack.c.bf16 %v115_v44, %v112_v15  ;;  %1321 = vmatprep.subr.bf16.mxu1 %v1320_v54  ;;  %v2324_v39 = vand.u32 4294901760, %v1901_v33  ;;  %v69_v16 = vld [vmem:[#allocation2 + $0x70] sm:$0xff]  ;;  %v70_v28 = vld [vmem:[#allocation2 + $0x78] sm:$0xff] }
  0x3b   :  { %v2326_v51 = vand.u32 4294901760, %v1904_v56  ;;  %v1920_v34 = vsub.f32 %v1882_v58, %v127_v57  ;;  %v2331_v23 = vand.u32 4294901760, %v1909_v31  ;;  %v181_v7 = vand.u32 4294901760, %v86_v13 }
  0x3c   :  { %2347 = vst [vmem:[#allocation10_spill] sm:$0xff] %v1915_v8  ;;  %v1322_v53 = vpack.c.bf16 %v296_v59, %v289_v17  ;;  %1287 = vmatpush3.bf16.msra.mxu0 %v1915_v8  ;;  %v2348_v18 = vand.u32 4294901760, %v1766_v22  ;;  %v2349_v15 = vand.u32 4294901760, %v1777_v40  ;;  %v414_v58 = vsub.f32 %v1901_v33, %v2324_v39 }
  0x3d   :  { %v421_v54 = vsub.f32 %v1904_v56, %v2326_v51  ;;  %v2336_v17 = vand.u32 4294901760, %v1920_v34  ;;  %v1937_v59 = vsub.f32 %v85_v60, %v178_v32  ;;  %v302_v22 = vsub.f32 %v1909_v31, %v2331_v23 }
  0x3e   :  { %v1928_v44 = vpack.c.bf16 %v2349_v15, %v2348_v18  ;;  %1323 = vmatpush3.bf16.msra.mxu1 %v1322_v53  ;;  %v1942_v40 = vsub.f32 %v86_v13, %v181_v7  ;;  %v130_v18 = vand.u32 4294901760, %v69_v16  ;;  %v133_v15 = vand.u32 4294901760, %v70_v28 }
  0x3f   :  { %v415_v39 = vand.u32 4294901760, %v414_v58  ;;  %v422_v46 = vand.u32 4294901760, %v421_v54  ;;  %v309_v51 = vsub.f32 %v1920_v34, %v2336_v17  ;;  %v2338_v60 = vand.u32 4294901760, %v1937_v59 }
  0x40   :  { %2350 = vst [vmem:[#allocation11_spill] sm:$0xff] %v1928_v44  ;;  %1289 = vmatprep.subr.bf16.mxu0 %v1928_v44  ;;  %v303_v8 = vand.u32 4294901760, %v302_v22  ;;  %v2337_v53 = vand.u32 4294901760, %v1942_v40  ;;  %v1950_v37 = vsub.f32 %v69_v16, %v130_v18  ;;  %v1952_v23 = vsub.f32 %v70_v28, %v133_v15 }
  0x41   :  { %v1324_v13 = vpack.c.bf16 %v422_v46, %v415_v39  ;;  %v310_v27 = vand.u32 4294901760, %v309_v51  ;;  %v428_v58 = vsub.f32 %v1937_v59, %v2338_v60  ;;  %v2351_v54 = vand.u32 4294901760, %v1807_v45 }
  0x42   :  { %v2352_v44 = vand.u32 4294901760, %v1809_v49  ;;  %v435_v22 = vsub.f32 %v1942_v40, %v2337_v53  ;;  %v315_v16 = vand.u32 4294901760, %v1950_v37  ;;  %v322_v28 = vand.u32 4294901760, %v1952_v23 }
  0x43   :  { %v1968_v46 = vpack.c.bf16 %v175_v35, %v172_v1  ;;  %1325 = vmatprep.subr.bf16.mxu1 %v1324_v13  ;;  %v1326_v39 = vpack.c.bf16 %v310_v27, %v303_v8  ;;  %v429_v51 = vand.u32 4294901760, %v428_v58  ;;  %v1971_v45 = vpack.c.bf16 %v127_v57, %v124_v47 }
  0x44   :  { %v1961_v17 = vpack.c.bf16 %v2352_v44, %v2351_v54  ;;  %v1973_v49 = vpack.c.bf16 %v181_v7, %v178_v32  ;;  %v436_v44 = vand.u32 4294901760, %v435_v22  ;;  %v316_v54 = vsub.f32 %v1950_v37, %v315_v16 }
  0x45   :  { %v323_v53 = vsub.f32 %v1952_v23, %v322_v28  ;;  %v1978_v60 = vpack.c.bf16 %v133_v15, %v130_v18  ;;  %1327 = vmatpush3.bf16.msra.mxu1 %v1326_v39  ;;  %v1332_v27 = vpack.c.bf16 %v1582_v19, %v1575_v14  ;;  %v2354_v39 = vand.u32 4294901760, %v1582_v19 }
  0x46   :  { %1291 = vmatpush3.bf16.msra.mxu0 %v1961_v17  ;;  %v1328_v57 = vpack.c.bf16 %v436_v44, %v429_v51  ;;  %v317_v8 = vand.u32 4294901760, %v316_v54  ;;  %v2355_v51 = vand.u32 4294901760, %v1585_v20  ;;  %v2356_v44 = vand.u32 4294901760, %v1588_v21 }
  0x47   :  { %1293 = vmatprep.subr.bf16.mxu0 %v1968_v46  ;;  %v324_v32 = vand.u32 4294901760, %v323_v53  ;;  %v2357_v54 = vand.u32 4294901760, %v1595_v24  ;;  %v2360_v19 = vand.u32 4294901760, %v1613_v30  ;;  %v2368_v13 = vand.u32 4294901760, %v1707_v42 }
  0x48   :  { %1329 = vmatprep.subr.bf16.mxu1 %v1328_v57  ;;  %v2024_v58 = vpack.c.bf16 %v2356_v44, %v2355_v51  ;;  %v2358_v57 = vand.u32 4294901760, %v1600_v25  ;;  %v2363_v51 = vand.u32 4294901760, %v1670_v3  ;;  %v2369_v15 = vand.u32 4294901760, %v1712_v11 }
  0x49   :  { %v1330_v22 = vpack.c.bf16 %v324_v32, %v317_v8  ;;  %v2353_v32 = vand.u32 4294901760, %v1575_v14  ;;  %v2359_v14 = vand.u32 4294901760, %v1605_v26  ;;  %v2365_v8 = vand.u32 4294901760, %v1680_v5 }
  0x4a   :  { %1295 = vmatpush3.bf16.msra.mxu0 %v1971_v45  ;;  %v2056_v18 = vpack.c.bf16 %v2369_v15, %v2368_v13  ;;  %v2380_v15 = vand.u32 4294901760, %v1820_v4  ;;  %v2381_v13 = vand.u32 4294901760, %v1838_v9 }
  0x4b   :  { %1297 = vmatprep.subr.bf16.mxu0 %v1973_v49  ;;  %1331 = vmatpush3.bf16.msra.mxu1 %v1330_v22  ;;  %v2018_v53 = vpack.c.bf16 %v2354_v39, %v2353_v32  ;;  %v2030_v22 = vpack.c.bf16 %v2358_v57, %v2357_v54  ;;  %v2038_v39 = vpack.c.bf16 %v2360_v19, %v2359_v14  ;;  %v2362_v32 = vand.u32 4294901760, %v1660_v62 }
  0x4c   :  { %1365 = vmatprep.subr.bf16.mxu1 %v1662_v63  ;;  %v2366_v54 = vand.u32 4294901760, %v1690_v10  ;;  %2370 = vst [vmem:[#allocation15_spill] sm:$0xff] %v2056_v18  ;;  %v2371_v14 = vand.u32 4294901760, %v1723_v43  ;;  %v2372_v19 = vand.u32 4294901760, %v1737_v55  ;;  %v2080_v35 = vpack.c.bf16 %v2381_v13, %v2380_v15 }
  0x4d   :  { %2361 = vst [vmem:[#allocation12_spill] sm:$0xff] %v2038_v39  ;;  %v2044_v44 = vpack.c.bf16 %v2363_v51, %v2362_v32  ;;  %v2374_v32 = vand.u32 4294901760, %v1782_v48  ;;  %v2375_v51 = vand.u32 4294901760, %v1787_v41  ;;  %v2392_v15 = vand.u32 4294901760, %v1937_v59 }
  0x4e   :  { %1299 = vmatpush3.bf16.msra.mxu0 %v1978_v60  ;;  %v2050_v57 = vpack.c.bf16 %v2366_v54, %v2365_v8  ;;  %v2062_v7 = vpack.c.bf16 %v2372_v19, %v2371_v14  ;;  %v2378_v8 = vand.u32 4294901760, %v1814_v0  ;;  %2382 = vst [vmem:[#allocation19_spill] sm:$0xff] %v2080_v35  ;;  %v2383_v14 = vand.u32 4294901760, %v1858_v29 }
  0x4f   :  { %2364 = vst [vmem:[#allocation13_spill] sm:$0xff] %v2044_v44  ;;  %1333 = vmatprep.subr.bf16.mxu0 %v1332_v27  ;;  %v2068_v47 = vpack.c.bf16 %v2375_v51, %v2374_v32  ;;  %v2377_v27 = vand.u32 4294901760, %v1804_v61  ;;  %v2384_v19 = vand.u32 4294901760, %v1863_v50  ;;  %v2386_v32 = vand.u32 4294901760, %v1901_v33 }
  0x50   :  { %2367 = vst [vmem:[#allocation14_spill] sm:$0xff] %v2050_v57  ;;  %2373 = vst [vmem:[#allocation16_spill] sm:$0xff] %v2062_v7  ;;  %v2387_v51 = vand.u32 4294901760, %v1904_v56  ;;  %v2393_v13 = vand.u32 4294901760, %v1942_v40 }
  0x51   :  { %2376 = vst [vmem:[#allocation17_spill] sm:$0xff] %v2068_v47  ;;  %v2074_v54 = vpack.c.bf16 %v2378_v8, %v2377_v27  ;;  %v2086_v1 = vpack.c.bf16 %v2384_v19, %v2383_v14  ;;  %v2389_v27 = vand.u32 4294901760, %v1909_v31  ;;  %v2390_v8 = vand.u32 4294901760, %v1920_v34 }
  0x52   :  { %v2092_v47 = vpack.c.bf16 %v2387_v51, %v2386_v32  ;;  %v2104_v35 = vpack.c.bf16 %v2393_v13, %v2392_v15  ;;  %v2106_v14 = vpack.c.bf16 %v322_v28, %v315_v16  ;;  %v28_v19 = vlaneseq }
  0x53   :  { %2379 = vst [vmem:[#allocation18_spill] sm:$0xff] %v2074_v54  ;;  %2385 = vst [vmem:[#allocation20_spill] sm:$0xff] %v2086_v1  ;;  %v2098_v54 = vpack.c.bf16 %v2390_v8, %v2389_v27  ;;  %v2396_v51 = vmov 0  ;;  %v1520_v27 = vmov 0.0   ;;  %v2343_v28 = vmov 1.0  }
  0x54   :  { %2388 = vst [vmem:[#allocation21_spill] sm:$0xff] %v2092_v47  ;;  %2394 = vst [vmem:[#allocation23_spill] sm:$0xff] %v2104_v35  ;;  %v29_v1 = vand.u32 127, %v28_v19 }
  0x55   :  { %2391 = vst [vmem:[#allocation22_spill] sm:$0xff] %v2098_v54  ;;  %2395 = vst [vmem:[#allocation24_spill] sm:$0xff] %v2106_v14 }
  0x56   :  { %v2108_v7 = vadd.s32 128, %v29_v1  ;;  %vm41_vm0 = vcmp.ne.s32.totalorder %v29_v1, 0 }
  0x94   :  { %v2110_v32 = vpop.permute.xlu0 %32 }
  0x95   :  { %vm37_vm1 = vcmp.eq.s32.totalorder %v29_v1, %v2110_v32  ;;  %vm38_vm2 = vcmp.eq.s32.totalorder %v2108_v7, %v2110_v32 }
  0x96   :  { %vm2116_vm3 = vmand %vm37_vm1, %vm41_vm0  ;;  %v1025_v16 = vsel %vm38_vm2, 1.0, %v1520_v27  ;;  %1028 = vmatprep.mubr.msk.f32.mxu1 %vm38_vm2, %v2343_v28 }
  0x97   :  { %v2397_v51 = vsel %vm2116_vm3, 4294967295, %v2396_v51  ;;  %v1024_v8 = vsel %vm2116_vm3, 1.0, %v1520_v27  ;;  %v184_v15 = vsub.f32 %v1025_v16, %v1025_v16  ;;  %1029 = vmatmul.mubr.msk.f32.vlgmr.msra.gmra.mrb[0].mxu1 %vm2116_vm3, %v2343_v28 }
  0x98   :  { %2398 = vst [vmem:[#allocation25_spill] sm:$0xff] %v2397_v51  ;;  %v2132_v13 = vsub.f32 %v1024_v8, %v1024_v8  ;;  %1367 = vmatpush3.bf16.msra.mxu1 %v1673_v6  ;;  %v2135_v19 = vpop.permute.xlu0 %35 }
  0x99   :  { %2399 = vst [vmem:[#allocation26_spill] sm:$0xff] %v2135_v19  ;;  %vm39_vm4 = vcmp.eq.s32.totalorder %v29_v1, %v2135_v19  ;;  %vm40_vm5 = vcmp.eq.s32.totalorder %v2108_v7, %v2135_v19  ;;  %1369 = vmatprep.subr.bf16.mxu1 %v1697_v36  ;;  %v185_v14 = vand.u32 4294901760, %v184_v15 }
  0x9a   :  { %vm2142_vm6 = vmand %vm39_vm4, %vm41_vm0  ;;  %v1027_v8 = vsel %vm40_vm5, 1.0, %v1520_v27  ;;  %1030 = vmatprep.mubr.msk.f32.mxu1 %vm40_vm5, %v2343_v28  ;;  %v191_v35 = vand.u32 4294901760, %v2132_v13 }
  0x9b   :  { %v1026_v54 = vsel %vm2142_vm6, 1.0, %v1520_v27  ;;  %v199_v51 = vsub.f32 %v1027_v8, %v1027_v8  ;;  %1031 = vmatmul.mubr.msk.f32.gmra.mrb[2].mxu1 %vm2142_vm6, %v2343_v28  ;;  %v186_v1 = vsub.f32 %v184_v15, %v185_v14  ;;  %v2403_v28 = vpack.c.bf16 %v1600_v25, %v1595_v24  ;;  %v2410_v25 = vld [vmem:[#allocation11_spill] sm:$0xff] }
  0x9c   :  { %v205_v47 = vsub.f32 %v1026_v54, %v1026_v54  ;;  %1371 = vmatpush3.bf16.msra.mxu1 %v1753_v12  ;;  %699 = vmatprep.mubr.f32.mxu1 %v185_v14  ;;  %v192_v18 = vsub.f32 %v2132_v13, %v191_v35  ;;  %v2402_v54 = vpack.c.bf16 %v1588_v21, %v1585_v20  ;;  %v2408_v21 = vld [vmem:[#allocation10_spill] sm:$0xff] }
  0x9d   :  { %1373 = vmatprep.subr.bf16.mxu1 %v1775_v2  ;;  %v187_v19 = vand.u32 4294901760, %v186_v1  ;;  %v200_v57 = vand.u32 4294901760, %v199_v51  ;;  %v2407_v20 = vpack.c.bf16 %v1670_v3, %v1660_v62  ;;  %v2409_v24 = vpack.c.bf16 %v1690_v10, %v1680_v5 }
  0x9e   :  { %v193_v44 = vand.u32 4294901760, %v192_v18  ;;  %v206_v39 = vand.u32 4294901760, %v205_v47  ;;  %v2404_v18 = vld [vmem:[#allocation8_spill] sm:$0xff]  ;;  %v2414_v62 = vpack.c.bf16 %v1814_v0, %v1804_v61  ;;  %v2415_v3 = vpack.c.bf16 %v1838_v9, %v1820_v4  ;;  %v2434_v0 = vld [vmem:[#allocation22_spill] sm:$0xff]  ;;  %v2435_v4 = vld [vmem:[#allocation23_spill] sm:$0xff] }
  0x9f   :  { %188 = vmatprep.mubr.f32.mxu0 %v187_v19  ;;  %v201_v27 = vsub.f32 %v199_v51, %v200_v57  ;;  %v2406_v19 = vld [vmem:[#allocation9_spill] sm:$0xff]  ;;  %v2416_v5 = vpack.c.bf16 %v1863_v50, %v1858_v29  ;;  %v2417_v10 = vpack.c.bf16 %v1904_v56, %v1901_v33  ;;  %v2418_v9 = vpack.c.bf16 %v1920_v34, %v1909_v31 }
  0xa0   :  { %1375 = vmatpush3.bf16.msra.mxu1 %v1796_v38  ;;  %194 = vmatmul.mubr.f32.vlgmr.msra.gmra.mrb[0].mxu0 %v193_v44  ;;  %v207_v8 = vsub.f32 %v205_v47, %v206_v39  ;;  %v2405_v44 = vpack.c.bf16 %v1613_v30, %v1605_v26  ;;  %v2412_v26 = vpack.c.bf16 %v1737_v55, %v1723_v43  ;;  %v2426_v43 = vld [vmem:[#allocation16_spill] sm:$0xff]  ;;  %v2428_v55 = vld [vmem:[#allocation18_spill] sm:$0xff] }
  0xa1   :  { %1335 = vmatpush3.bf16.msra.mxu0 %v2402_v54  ;;  %1377 = vmatprep.subr.bf16.mxu1 %v1826_v52  ;;  %v202_v14 = vand.u32 4294901760, %v201_v27  ;;  %v2413_v30 = vpack.c.bf16 %v1787_v41, %v1782_v48  ;;  %v2419_v29 = vpack.c.bf16 %v1942_v40, %v1937_v59  ;;  %v2421_v33 = vpack.c.bf16 %v1952_v23, %v1950_v37  ;;  %v2427_v48 = vld [vmem:[#allocation17_spill] sm:$0xff] }
  0xa2   :  { %1337 = vmatprep.subr.bf16.mxu0 %v2403_v28  ;;  %v208_v1 = vand.u32 4294901760, %v207_v8  ;;  %v2411_v28 = vpack.c.bf16 %v1712_v11, %v1707_v42  ;;  %v2424_v42 = vld [vmem:[#allocation14_spill] sm:$0xff]  ;;  %v2425_v11 = vld [vmem:[#allocation15_spill] sm:$0xff]  ;;  %v2431_v41 = vld [vmem:[#allocation21_spill] sm:$0xff] }
  0xa3   :  { %203 = vmatprep.mubr.f32.mxu0 %v202_v14 }
  0xa4   :  { %1379 = vmatpush3.bf16.msra.mxu1 %v2404_v18  ;;  %209 = vmatmul.mubr.f32.gmra.mrb[2].mxu0 %v208_v1 }
  0xa5   :  { %1339 = vmatpush3.bf16.msra.mxu0 %v2405_v44  ;;  %583 = vmatprep.mubr.f32.mxu0 %v184_v15 }
  0xa6   :  { %1381 = vmatprep.subr.bf16.mxu1 %v2406_v19  ;;  %1341 = vmatprep.subr.bf16.mxu0 %v2407_v20 }
  0xa8   :  { %1383 = vmatpush3.bf16.msra.mxu1 %v2408_v21 }
  0xa9   :  { %1343 = vmatpush3.bf16.msra.mxu0 %v2409_v24  ;;  %1385 = vmatprep.subr.bf16.mxu1 %v2410_v25 }
  0xaa   :  { %1345 = vmatprep.subr.bf16.mxu0 %v2411_v28 }
  0xac   :  { %1387 = vmatpush3.bf16.msra.mxu1 %v1961_v17 }
  0xad   :  { %1347 = vmatpush3.bf16.msra.mxu0 %v2412_v26  ;;  %1389 = vmatprep.subr.bf16.mxu1 %v1968_v46 }
  0xae   :  { %1349 = vmatprep.subr.bf16.mxu0 %v2413_v30 }
  0xb0   :  { %1391 = vmatpush3.bf16.msra.mxu1 %v1971_v45 }
  0xb1   :  { %1351 = vmatpush3.bf16.msra.mxu0 %v2414_v62  ;;  %1393 = vmatprep.subr.bf16.mxu1 %v1973_v49 }
  0xb2   :  { %1353 = vmatprep.subr.bf16.mxu0 %v2415_v3 }
  0xb4   :  { %1395 = vmatpush3.bf16.msra.mxu1 %v1978_v60 }
  0xb5   :  { %1355 = vmatpush3.bf16.msra.mxu0 %v2416_v5  ;;  %1429 = vmatprep.subr.bf16.mxu1 %v1662_v63  ;;  %v2420_v63 = vmov 1.0  }
  0xb6   :  { %1357 = vmatprep.subr.bf16.mxu0 %v2417_v10 }
  0xb7   :  { %703 = vmatmul.mubr.f32.vlgmr.msra.gmra.mrb[4].mxu1 %v191_v35 }
  0xb8   :  { %710 = vmatprep.mubr.f32.mxu1 %v200_v57  ;;  %1431 = vmatpush3.bf16.msra.mxu1 %v1673_v6  ;;  %v2422_v6 = vld [vmem:[#allocation12_spill] sm:$0xff] }
  0xb9   :  { %1359 = vmatpush3.bf16.msra.mxu0 %v2418_v9  ;;  %1433 = vmatprep.subr.bf16.mxu1 %v1697_v36  ;;  %v2423_v36 = vld [vmem:[#allocation13_spill] sm:$0xff] }
  0xba   :  { %1361 = vmatprep.subr.bf16.mxu0 %v2419_v29 }
  0xbb   :  { %714 = vmatmul.mubr.f32.gmra.mrb[6].mxu1 %v206_v39 }
  0xbc   :  { %1435 = vmatpush3.bf16.msra.mxu1 %v1753_v12  ;;  %1036 = vmatprep.mubr.msk.f32.mxu1 %vm38_vm2, %v2420_v63  ;;  %v2429_v12 = vld [vmem:[#allocation19_spill] sm:$0xff] }
  0xbd   :  { %1363 = vmatpush3.bf16.msra.mxu0 %v2421_v33  ;;  %1437 = vmatprep.subr.bf16.mxu1 %v1775_v2  ;;  %v2430_v2 = vld [vmem:[#allocation20_spill] sm:$0xff] }
  0xbe   :  { %1397 = vmatprep.subr.bf16.mxu0 %v2018_v53 }
  0xc0   :  { %586 = vmatmul.mubr.f32.vlgmr.msra.gmra.mrb[4].mxu0 %v2132_v13  ;;  %1439 = vmatpush3.bf16.msra.mxu1 %v1796_v38 }
  0xc1   :  { %592 = vmatprep.mubr.f32.mxu0 %v199_v51  ;;  %1399 = vmatpush3.bf16.msra.mxu0 %v2024_v58 }
  0xc2   :  { %1441 = vmatprep.subr.bf16.mxu1 %v1826_v52  ;;  %1401 = vmatprep.subr.bf16.mxu0 %v2030_v22  ;;  %v2436_v52 = vld [vmem:[#allocation24_spill] sm:$0xff] }
  0xc4   :  { %595 = vmatmul.mubr.f32.gmra.mrb[6].mxu0 %v205_v47  ;;  %1443 = vmatpush3.bf16.msra.mxu1 %v2404_v18 }
  0xc5   :  { %1403 = vmatpush3.bf16.msra.mxu0 %v2422_v6  ;;  %1032 = vmatprep.mubr.msk.f32.mxu0 %vm38_vm2, %v2420_v63 }
  0xc6   :  { %1445 = vmatprep.subr.bf16.mxu1 %v2406_v19  ;;  %1405 = vmatprep.subr.bf16.mxu0 %v2423_v36 }
  0xc8   :  { %1447 = vmatpush3.bf16.msra.mxu1 %v2408_v21 }
  0xc9   :  { %1407 = vmatpush3.bf16.msra.mxu0 %v2424_v42  ;;  %1449 = vmatprep.subr.bf16.mxu1 %v2410_v25 }
  0xca   :  { %1409 = vmatprep.subr.bf16.mxu0 %v2425_v11 }
  0xcc   :  { %1451 = vmatpush3.bf16.msra.mxu1 %v1961_v17 }
  0xcd   :  { %1411 = vmatpush3.bf16.msra.mxu0 %v2426_v43  ;;  %1453 = vmatprep.subr.bf16.mxu1 %v1968_v46 }
  0xce   :  { %1413 = vmatprep.subr.bf16.mxu0 %v2427_v48 }
  0xd0   :  { %1455 = vmatpush3.bf16.msra.mxu1 %v1971_v45 }
  0xd1   :  { %1415 = vmatpush3.bf16.msra.mxu0 %v2428_v55  ;;  %1457 = vmatprep.subr.bf16.mxu1 %v1973_v49 }
  0xd2   :  { %1417 = vmatprep.subr.bf16.mxu0 %v2429_v12 }
  0xd4   :  { %1459 = vmatpush3.bf16.msra.mxu1 %v1978_v60 }
  0xd5   :  { %1419 = vmatpush3.bf16.msra.mxu0 %v2430_v2 }
  0xd6   :  { %1421 = vmatprep.subr.bf16.mxu0 %v2431_v41 }
  0xd7   :  { %1037 = vmatmul.mubr.msk.f32.vlgmr.msra.gmra.mrb[8].mxu1 %vm2116_vm3, %v2420_v63 }
  0xd8   :  { %1038 = vmatprep.mubr.msk.f32.mxu1 %vm40_vm5, %v2420_v63 }
  0xd9   :  { %1423 = vmatpush3.bf16.msra.mxu0 %v2434_v0 }
  0xda   :  { %1425 = vmatprep.subr.bf16.mxu0 %v2435_v4 }
  0xdb   :  { %1039 = vmatmul.mubr.msk.f32.gmra.mrb[10].mxu1 %vm2142_vm6, %v2420_v63 }
  0xdd   :  { %1427 = vmatpush3.bf16.msra.mxu0 %v2436_v52 }
  0xe0   :  { %1033 = vmatmul.mubr.msk.f32.vlgmr.msra.gmra.mrb[8].mxu0 %vm2116_vm3, %v2420_v63 }
  0xe1   :  { %1034 = vmatprep.mubr.msk.f32.mxu0 %vm40_vm5, %v2420_v63 }
  0xe4   :  { %1035 = vmatmul.mubr.msk.f32.gmra.mrb[10].mxu0 %vm2142_vm6, %v2420_v63 }
 0x16a   :  { %v1110_v50 = vpop.f32.mrb[0].mxu1 }
 0x16b   :  { %v1111_v37 = vpop.f32.mrb[1].mxu1 }
 0x16c   :  { %v1112_v56 = vadd.f32 %v1111_v37, %v1110_v50 }
 0x16e   :  { %v1113_v31 = vpop.f32.mrb[2].mxu1 }
 0x16f   :  { %v1114_v34 = vpop.f32.mrb[3].mxu1 }
 0x170   :  { %v1115_v23 = vadd.f32 %v1114_v34, %v1113_v31 }
 0x173   :  { %v1072_v17 = vpop.f32.mrb[0].mxu0 }
 0x174   :  { %v1073_v59 = vpop.f32.mrb[1].mxu0 }
 0x175   :  { %v1074_v40 = vadd.f32 %v1073_v59, %v1072_v17 }
 0x177   :  { %v443_v60 = vadd.f32 %v1112_v56, %v1074_v40  ;;  %v1075_v46 = vpop.f32.mrb[2].mxu0 }
 0x178   :  { %v1076_v45 = vpop.f32.mrb[3].mxu0 }
 0x179   :  { %v1077_v49 = vadd.f32 %v1076_v45, %v1075_v46 }
 0x17b   :  { %v450_v35 = vadd.f32 %v1115_v23, %v1077_v49 }
 0x18a   :  { %v1186_v47 = vpop.f32.mrb[4].mxu1 }
 0x18b   :  { %v1187_v7 = vpop.f32.mrb[5].mxu1 }
 0x18c   :  { %v1188_v58 = vadd.f32 %v1187_v7, %v1186_v47 }
 0x18e   :  { %v1189_v53 = vpop.f32.mrb[6].mxu1 }
 0x18f   :  { %v1190_v22 = vpop.f32.mrb[7].mxu1 }
 0x190   :  { %v1191_v39 = vadd.f32 %v1190_v22, %v1189_v53 }
 0x193   :  { %v1148_v57 = vpop.f32.mrb[4].mxu0 }
 0x194   :  { %v1149_v32 = vpop.f32.mrb[5].mxu0 }
 0x195   :  { %v1150_v51 = vadd.f32 %v1149_v32, %v1148_v57 }
 0x197   :  { %v588_v15 = vadd.f32 %v1150_v51, %v443_v60  ;;  %v1151_v13 = vpop.f32.mrb[6].mxu0 }
 0x198   :  { %v1152_v16 = vpop.f32.mrb[7].mxu0 }
 0x199   :  { %v1153_v27 = vadd.f32 %v1152_v16, %v1151_v13  ;;  %v705_v8 = vadd.f32 %v1188_v58, %v588_v15 }
 0x19b   :  { %v597_v54 = vadd.f32 %v1153_v27, %v450_v35 }
 0x19d   :  { %v716_v14 = vadd.f32 %v1191_v39, %v597_v54 }
 0x1aa   :  { %v1262_v1 = vpop.f32.mrb[8].mxu1 }
 0x1ab   :  { %v1263_v18 = vpop.f32.mrb[9].mxu1 }
 0x1ac   :  { %v1264_v44 = vadd.f32 %v1263_v18, %v1262_v1 }
 0x1ae   :  { %v1265_v19 = vpop.f32.mrb[10].mxu1 }
 0x1af   :  { %v1266_v20 = vpop.f32.mrb[11].mxu1 }
 0x1b0   :  { %v1267_v21 = vadd.f32 %v1266_v20, %v1265_v19 }
 0x1b3   :  { %v1224_v24 = vpop.f32.mrb[8].mxu0 }
 0x1b4   :  { %v1225_v25 = vpop.f32.mrb[9].mxu0 }
 0x1b5   :  { %v1226_v28 = vadd.f32 %v1225_v25, %v1224_v24 }
 0x1b7   :  { %v884_v26 = vadd.f32 %v1226_v28, %v705_v8  ;;  %v1227_v30 = vpop.f32.mrb[10].mxu0 }
 0x1b8   :  { %v1228_v62 = vpop.f32.mrb[11].mxu0 }
 0x1b9   :  { %v995_v3 = vadd.f32 %v1264_v44, %v884_v26  ;;  %v1229_v5 = vadd.f32 %v1228_v62, %v1227_v30 }
 0x1bb   :  { %1005 = vst [vmem:[#allocation5] sm:$0xff] %v995_v3  ;;  %v891_v10 = vadd.f32 %v1229_v5, %v716_v14 }
 0x1bd   :  { %v1002_v9 = vadd.f32 %v1267_v21, %v891_v10 }
 0x1bf   :  { %1006 = vst [vmem:[#allocation5 + $0x8] sm:$0xff] %v1002_v9 }
 0x1c0   :  { %1501 = shalt.err (!%p1498_p12)
}
 0x1c1   :  { %s1502_s30 = scalar_lea.hbm %s2296_s2, 256 }
 0x1c2   :  { %p1503_p13 = scmp.ne.s32.totalorder %s2296_s2, %s1502_s30  ;;  %p1506_p0 = scmp.lt.u32.totalorder %s1502_s30, %s2296_s2 }
 0x1c4   :  { %p1508_p1 = pnand %p1506_p0, %p1503_p13 }
 0x1c6   :  { %1511 = shalt.err (!%p1508_p1)
}
 0x1c7   :  { %1018 = dma.vmem_to_hbm [thread:$0]  %s1013_s1, 256, %s2296_s2, [#allocation4], %s1517_s19, %s1517_s19, %s1518_s20  }
 0x1c8   :  { %1514 = dma.done.wait [#allocation4], 256  }
 0x1c9   :  { %1515 = vsyncadd [#allocation4], 4294967040 }
 0x1ca   :  { %1022 = vsyncpa [#allocation3], 1 }
 0x1cb   :  { %1023 = vsyncpa [#allocation4], 1 }

</bundles_post_ra>
